<compile_context>
chip_gen: v7x
topology: tpu7x:2x2x1
jax: 0.10.0
libtpu: 0.0.40
codegen_flags: <defaults>
</compile_context>

<pallas_src>
import math

import jax
import jax.numpy as jnp
from jax.experimental import pallas as pl
from jax.experimental.pallas import tpu as pltpu


def _round_up(x, m):
    return (x + m - 1) // m * m


def _sublane(dtype):
    """Minimum second-minor multiple for a dtype (f32: 8, bf16: 16, i8: 32)."""
    return max(8, 32 // jnp.dtype(dtype).itemsize)


def _default_tiles():
    """Generation-dependent tile defaults (capped to problem size at call time)."""
    try:
        vmem_cap = int(pltpu.get_tpu_info().vmem_capacity_bytes)
    except Exception:  # conservative fallback if query unavailable
        vmem_cap = 64 * 1024 * 1024
    if vmem_cap >= 100 * 1024 * 1024:
        # v5e / v6e: 128 MiB VMEM -> large tiles, AI past the ridge point.
        return dict(tm=1536, tn=1536, tk=512, vmem_limit=96 * 1024 * 1024)
    # v7x-class: 64 MiB per TensorCore -> smaller tiles, leave DMA headroom.
    return dict(tm=1024, tn=768, tk=512, vmem_limit=48 * 1024 * 1024)


# ---------------------------------------------------------------------------
# Kernel 1: LoRA down-projection  down = x @ W_down^T   (M, K) x (K, r) -> (M, r)
# ---------------------------------------------------------------------------
def _down_proj_kernel(x_ref, w_down_ref, o_ref, acc_ref):
    k = pl.program_id(1)

    @pl.when(k == 0)
    def _init():
        acc_ref[...] = jnp.zeros_like(acc_ref)

    acc_ref[...] += jnp.dot(x_ref[...], w_down_ref[...],
                            preferred_element_type=jnp.float32)

    @pl.when(k == pl.num_programs(1) - 1)
    def _finalize():
        o_ref[...] = acc_ref[...].astype(o_ref.dtype)


def lora_down_proj(x2d, w_down_t, *, tm, tk, vmem_limit):
    """x2d: (M, K) padded; w_down_t: (K, r_pad). Returns (M, r_pad) in x2d.dtype."""
    M, K = x2d.shape
    r_pad = w_down_t.shape[1]
    assert M % tm == 0 and K % tk == 0

    return pl.pallas_call(
        _down_proj_kernel,
        out_shape=jax.ShapeDtypeStruct((M, r_pad), x2d.dtype),
        grid_spec=pltpu.PrefetchScalarGridSpec(
            num_scalar_prefetch=0,
            grid=(M // tm, K // tk),
            in_specs=[
                pl.BlockSpec((tm, tk), lambda i, k: (i, k)),
                pl.BlockSpec((tk, r_pad), lambda i, k: (k, 0)),
            ],
            out_specs=pl.BlockSpec((tm, r_pad), lambda i, k: (i, 0)),
            scratch_shapes=[pltpu.VMEM((tm, r_pad), jnp.float32)],
        ),
        compiler_params=pltpu.CompilerParams(
            dimension_semantics=("parallel", "arbitrary"),
            vmem_limit_bytes=vmem_limit,
        ),
    )(x2d, w_down_t)


# ---------------------------------------------------------------------------
# Kernel 2: main fused matmul  y = x @ W_org^T + b + down @ (W_up^T * m * s)
# ---------------------------------------------------------------------------
def _lora_linear_kernel(x_ref, w_org_ref, b_ref, down_ref, w_up_ref,
                        o_ref, acc_ref):
    """Grid point (i, j, k): accumulate base matmul over K, add LoRA-up at the end."""
    k = pl.program_id(2)

    @pl.when(k == 0)
    def _init():
        # Bias folded into the f32 accumulator init.
        acc_ref[...] = jnp.broadcast_to(b_ref[...], acc_ref.shape)

    acc_ref[...] += jnp.dot(x_ref[...], w_org_ref[...],
                            preferred_element_type=jnp.float32)

    @pl.when(k == pl.num_programs(2) - 1)
    def _finalize():
        # multiplier * scale already folded into w_up; down/w_up in compute dtype
        # (bf16 on the fast path), accumulation in f32.
        up = jnp.dot(down_ref[...], w_up_ref[...],
                     preferred_element_type=jnp.float32)
        o_ref[...] = (acc_ref[...] + up).astype(o_ref.dtype)


def lora_linear(x2d, w_org_t, bias_row, down, w_up_t, *, tm, tn, tk,
                out_dtype, vmem_limit):
    M, K = x2d.shape
    N = w_org_t.shape[1]
    r_pad = w_up_t.shape[0]
    assert M % tm == 0 and N % tn == 0 and K % tk == 0

    return pl.pallas_call(
        _lora_linear_kernel,
        out_shape=jax.ShapeDtypeStruct((M, N), out_dtype),
        grid_spec=pltpu.PrefetchScalarGridSpec(
            num_scalar_prefetch=0,
            grid=(M // tm, N // tn, K // tk),
            in_specs=[
                pl.BlockSpec((tm, tk), lambda i, j, k: (i, k)),     # x tile
                pl.BlockSpec((tk, tn), lambda i, j, k: (k, j)),     # W_org^T tile
                pl.BlockSpec((1, tn), lambda i, j, k: (0, j)),      # bias tile (f32)
                pl.BlockSpec((tm, r_pad), lambda i, j, k: (i, 0)),  # precomputed down
                pl.BlockSpec((r_pad, tn), lambda i, j, k: (0, j)),  # W_up^T * m * s
            ],
            out_specs=pl.BlockSpec((tm, tn), lambda i, j, k: (i, j)),
            scratch_shapes=[
                pltpu.VMEM((tm, tn), jnp.float32),  # base + bias accumulator
            ],
        ),
        compiler_params=pltpu.CompilerParams(
            dimension_semantics=("parallel", "parallel", "arbitrary"),
            vmem_limit_bytes=vmem_limit,
        ),
    )(x2d, w_org_t, bias_row, down, w_up_t)


# ---------------------------------------------------------------------------
# One-time parameter preparation + forward wrapper
# ---------------------------------------------------------------------------
def prepare_lora_linear_params(w_org, b_org, w_down, w_up, *,
                               multiplier, scale,
                               compute_dtype=jnp.bfloat16,
                               tm=None, tn=None, tk=None,
                               vmem_limit_bytes=None):
    """One-time prep: transpose to (in, out), fold multiplier*scale into W_up,
    cast operands to the compute dtype (bf16 fast path by default), and pad
    K/N (and r to the sublane multiple). Do NOT call per step."""
    defaults = _default_tiles()
    tm = defaults["tm"] if tm is None else tm
    tn = defaults["tn"] if tn is None else tn
    tk = defaults["tk"] if tk is None else tk
    vmem_limit = defaults["vmem_limit"] if vmem_limit_bytes is None else vmem_limit_bytes

    out_dim, in_dim = w_org.shape
    r = w_down.shape[0]
    r_pad = _round_up(r, _sublane(compute_dtype))

    tk_eff = min(tk, _round_up(in_dim, 128))
    tn_eff = min(tn, _round_up(out_dim, 128))
    k_pad = _round_up(in_dim, tk_eff)
    n_pad = _round_up(out_dim, tn_eff)

    mscale = float(multiplier) * float(scale)

    w_org_t = jnp.zeros((k_pad, n_pad), compute_dtype)
    w_org_t = w_org_t.at[:in_dim, :out_dim].set(w_org.astype(compute_dtype).T)

    if b_org is None:
        bias_row = jnp.zeros((1, n_pad), jnp.float32)
    else:
        bias_row = jnp.zeros((1, n_pad), jnp.float32)
        bias_row = bias_row.at[0, :out_dim].set(b_org.astype(jnp.float32))

    w_down_t = jnp.zeros((k_pad, r_pad), compute_dtype)
    w_down_t = w_down_t.at[:in_dim, :r].set(w_down.astype(compute_dtype).T)

    # Fold multiplier*scale in f32, then cast once to the compute dtype.
    w_up_t = jnp.zeros((r_pad, n_pad), jnp.float32)
    w_up_t = w_up_t.at[:r, :out_dim].set(w_up.astype(jnp.float32).T * mscale)
    w_up_t = w_up_t.astype(compute_dtype)

    return {
        "w_org_t": w_org_t, "bias_row": bias_row,
        "w_down_t": w_down_t, "w_up_t": w_up_t,
        "in_dim": in_dim, "out_dim": out_dim,
        "compute_dtype": jnp.dtype(compute_dtype),
        "tm": tm, "tk": tk_eff, "tn": tn_eff,
        "vmem_limit": vmem_limit,
    }


def lora_module_forward(x, prepared, *, tm=None):
    """Mirrors LoRAModule.forward for a Linear org_module.

    x: (..., in_dim) -> returns (..., out_dim) in x.dtype.
    """
    lead = x.shape[:-1]
    in_dim = prepared["in_dim"]
    out_dim = prepared["out_dim"]
    k_pad = prepared["w_org_t"].shape[0]
    compute_dtype = prepared["compute_dtype"]
    vmem_limit = prepared["vmem_limit"]
    assert x.shape[-1] == in_dim

    out_dtype = x.dtype
    x2d = x.reshape(-1, in_dim).astype(compute_dtype)
    M = x2d.shape[0]

    tm = prepared["tm"] if tm is None else tm
    sub = _sublane(compute_dtype)
    tm_eff = min(tm, _round_up(M, sub))
    m_pad = _round_up(M, tm_eff)

    if (m_pad, k_pad) != x2d.shape:
        x2d = jnp.pad(x2d, ((0, m_pad - M), (0, k_pad - in_dim)))

    # Rank-r down projection: computed once per row tile (not per N-tile/K-step).
    down = lora_down_proj(x2d, prepared["w_down_t"],
                          tm=tm_eff, tk=prepared["tk"], vmem_limit=vmem_limit)

    y2d = lora_linear(x2d, prepared["w_org_t"], prepared["bias_row"],
                      down, prepared["w_up_t"],
                      tm=tm_eff, tn=prepared["tn"], tk=prepared["tk"],
                      out_dtype=out_dtype, vmem_limit=vmem_limit)
    return y2d[:M, :out_dim].reshape(*lead, out_dim)


# ---------------------------------------------------------------------------
# Reference + tests
# ---------------------------------------------------------------------------
def _reference(x, w_org, b_org, w_down, w_up, multiplier, scale):
    x2d = x.reshape(-1, x.shape[-1]).astype(jnp.float32)
    base = x2d @ w_org.astype(jnp.float32).T + b_org.astype(jnp.float32)
    lora = (x2d @ w_down.astype(jnp.float32).T) @ w_up.astype(jnp.float32).T
    y = base + lora * multiplier * scale
    return y.reshape(*x.shape[:-1], w_org.shape[0])


def _run_case(key, batch, seq, in_dim, out_dim, lora_dim, *,
              multiplier, alpha, compute_dtype,
              tm=None, tn=None, tk=None, atol=1e-4, rtol=1e-4):
    scale = alpha / lora_dim  # LoRAModule: self.scale = alpha / self.lora_dim
    kx, ko, kb, kd, ku = jax.random.split(key, 5)

    x = jax.random.normal(kx, (batch, seq, in_dim), dtype=jnp.float32)

    # org_module = nn.Linear(in_dim, out_dim): weight (out, in), bias (out,)
    w_org = jax.random.normal(ko, (out_dim, in_dim), dtype=jnp.float32) * 0.1
    b_org = jax.random.normal(kb, (out_dim,), dtype=jnp.float32) * 0.1

    # lora_down: kaiming_uniform_(a=1) => U(-sqrt(3/fan_in), sqrt(3/fan_in))
    bound = math.sqrt(3.0 / in_dim)
    w_down = jax.random.uniform(kd, (lora_dim, in_dim), dtype=jnp.float32,
                                minval=-bound, maxval=bound)
    # lora_up is zero-init in the module; use small nonzero values here so the
    # LoRA path is exercised numerically.
    w_up = jax.random.normal(ku, (out_dim, lora_dim), dtype=jnp.float32) * 0.05

    prepared = prepare_lora_linear_params(
        w_org, b_org, w_down, w_up,
        multiplier=multiplier, scale=scale,
        compute_dtype=compute_dtype, tm=tm, tn=tn, tk=tk)

    y = lora_module_forward(x, prepared)
    y = jax.block_until_ready(y)

    ref = _reference(x, w_org, b_org, w_down, w_up, multiplier, scale)
    assert y.shape == (batch, seq, out_dim)
    assert jnp.allclose(y, ref, atol=atol, rtol=rtol), \
        f"mismatch vs reference: max abs err {jnp.max(jnp.abs(y - ref))}"


if __name__ == "__main__":
    key = jax.random.PRNGKey(0)
    k1, k2, k3 = jax.random.split(key, 3)

    # Case 1: small shapes, pure f32 path (tight tolerance); exercises K/N
    # zero-padding of ragged dims on a single-tile grid.
    _run_case(k1, batch=2, seq=8, in_dim=32, out_dim=32, lora_dim=4,
              multiplier=1.0, alpha=1.0, compute_dtype=jnp.float32,
              atol=1e-4, rtol=1e-4)

    # Case 2: bf16 fast path with a 2x2x2 main grid (M/N/K tiling + K
    # accumulation) and a 2x2 down-projection grid: tm=16, tn=tk=128 on a
    # (32, 256) x (256, 256) problem.
    _run_case(k2, batch=2, seq=16, in_dim=256, out_dim=256, lora_dim=4,
              multiplier=0.7, alpha=2.0, compute_dtype=jnp.bfloat16,
              tm=16, tn=128, tk=128, atol=5e-2, rtol=5e-2)

    # Case 3: bf16 with ragged M/K/N (21 rows, 96 -> 160 features) using the
    # generation-default tiles capped to the problem size.
    _run_case(k3, batch=3, seq=7, in_dim=96, out_dim=160, lora_dim=4,
              multiplier=1.0, alpha=4.0, compute_dtype=jnp.bfloat16,
              atol=5e-2, rtol=5e-2)

    print("KERNEL_OK")
</pallas_src>

<mosaic_0001>
module attributes {stable_mosaic.version = 11 : i64} {
  func.func @_down_proj_kernel(%arg0: i32, %arg1: i32, %arg2: memref<16x128xf32, #tpu.memory_space<vmem>>, %arg3: memref<128x8xf32, #tpu.memory_space<vmem>>, %arg4: memref<16x8xf32, #tpu.memory_space<vmem>>, %arg5: memref<16x8xf32, #tpu.memory_space<vmem>>) attributes {dimension_semantics = [#tpu.dimension_semantics<parallel>, #tpu.dimension_semantics<arbitrary>], iteration_bounds = array<i64: 1, 1>, scalar_prefetch = 0 : i64, scratch_operands = 1 : i64, tpu.core_type = #tpu.core_type<tc>, window_params = [{transform_indices = @transform_0, window_bounds = array<i64: 16, 128>}, {transform_indices = @transform_1, window_bounds = array<i64: 128, 8>}, {transform_indices = @transform_2, window_bounds = array<i64: 16, 8>}]} {
    %c0_i32 = arith.constant 0 : i32
    %0 = arith.cmpi eq, %arg1, %c0_i32 : i32
    %1 = arith.extui %0 : i1 to i32
    %c0_i32_0 = arith.constant 0 : i32
    %2 = arith.cmpi ne, %1, %c0_i32_0 : i32
    scf.if %2 {
      %cst_10 = arith.constant 0.000000e+00 : f32
      %12 = vector.broadcast %cst_10 : f32 to vector<16x8xf32>
      %c0_11 = arith.constant 0 : index
      %c0_12 = arith.constant 0 : index
      %13 = vector.load %arg5[%c0_11, %c0_12] : memref<16x8xf32, #tpu.memory_space<vmem>>, vector<16x8xf32>
      tpu.vector_store %arg5[%c0_11, %c0_12], %12 {strides = array<i32>} : memref<16x8xf32, #tpu.memory_space<vmem>>, vector<16x8xf32>,
    } else {
    }
    %c0 = arith.constant 0 : index
    %c0_1 = arith.constant 0 : index
    %3 = vector.load %arg5[%c0, %c0_1] : memref<16x8xf32, #tpu.memory_space<vmem>>, vector<16x8xf32>
    %c0_2 = arith.constant 0 : index
    %c0_3 = arith.constant 0 : index
    %4 = vector.load %arg2[%c0_2, %c0_3] : memref<16x128xf32, #tpu.memory_space<vmem>>, vector<16x128xf32>
    %c0_4 = arith.constant 0 : index
    %c0_5 = arith.constant 0 : index
    %5 = vector.load %arg3[%c0_4, %c0_5] : memref<128x8xf32, #tpu.memory_space<vmem>>, vector<128x8xf32>
    %cst = arith.constant dense<0.000000e+00> : vector<16x8xf32>
    %6 = tpu.matmul %4, %5, %cst {dimension_numbers = #tpu.dot_dimension_numbers<[1], [0], [0], [1], [0, 0, 1, 1], [], []>} : vector<16x128xf32>, vector<128x8xf32>, vector<16x8xf32> -> vector<16x8xf32>
    %7 = arith.addf %3, %6 : vector<16x8xf32>
    %c0_6 = arith.constant 0 : index
    %c0_7 = arith.constant 0 : index
    %8 = vector.load %arg5[%c0_6, %c0_7] : memref<16x8xf32, #tpu.memory_space<vmem>>, vector<16x8xf32>
    tpu.vector_store %arg5[%c0_6, %c0_7], %7 {strides = array<i32>} : memref<16x8xf32, #tpu.memory_space<vmem>>, vector<16x8xf32>,
    %c0_i32_8 = arith.constant 0 : i32
    %9 = arith.cmpi eq, %arg1, %c0_i32_8 : i32
    %10 = arith.extui %9 : i1 to i32
    %c0_i32_9 = arith.constant 0 : i32
    %11 = arith.cmpi ne, %10, %c0_i32_9 : i32
    scf.if %11 {
      %c0_10 = arith.constant 0 : index
      %c0_11 = arith.constant 0 : index
      %12 = vector.load %arg5[%c0_10, %c0_11] : memref<16x8xf32, #tpu.memory_space<vmem>>, vector<16x8xf32>
      %c0_12 = arith.constant 0 : index
      %c0_13 = arith.constant 0 : index
      %13 = vector.load %arg4[%c0_12, %c0_13] : memref<16x8xf32, #tpu.memory_space<vmem>>, vector<16x8xf32>
      tpu.vector_store %arg4[%c0_12, %c0_13], %12 {strides = array<i32>} : memref<16x8xf32, #tpu.memory_space<vmem>>, vector<16x8xf32>,
    } else {
    }
    return
  }
  func.func @transform_0(%arg0: i32, %arg1: i32) -> (i32, i32) {
    %c0_i32 = arith.constant 0 : i32
    return %arg0, %arg1 : i32, i32
  }
  func.func @transform_1(%arg0: i32, %arg1: i32) -> (i32, i32) {
    %c0_i32 = arith.constant 0 : i32
    %c0_i32_0 = arith.constant 0 : i32
    return %arg1, %c0_i32 : i32, i32
  }
  func.func @transform_2(%arg0: i32, %arg1: i32) -> (i32, i32) {
    %c0_i32 = arith.constant 0 : i32
    %c0_i32_0 = arith.constant 0 : i32
    return %arg0, %c0_i32 : i32, i32
  }
}

</mosaic_0001>

<bundles_post_ra>
// kernel: tpu_custom_call.1
= control target key start
LH: loop header
LB: loop body
LE: loop exit
PB: predicated region body
PF: predicated region fallthrough
CT: control target
= control target key end

     0   :  { %vm15_vm0 = vcmask 64512   ;;  %v215_v3 = vmov 0.0   ;;  %s297_s1 = inlined_call_operand.vmem [shape: f32[128,8], index: 1, kind: input, shape index: {}]   ;;  %s298_s0 = inlined_call_operand.vmem [shape: f32[16,128], index: 0, kind: input, shape index: {}]   ;;  %s299_s2 = inlined_call_operand.vmem [shape: f32[16,8], index: 2, kind: output, shape index: {}]  }
   0x1   :  { %v22_v0 = vld [vmem:[%s297_s1] sm:$0xff]  ;;  %v23_v1 = vld [vmem:[%s297_s1 + $0x8] sm:$0xff]  ;;  %v24_v2 = vld [vmem:[%s297_s1 + $0x10] sm:$0xff]  ;;  %17 = vst.msk [vmem:[#allocation2 + $0x8] sm:$0xff] %vm15_vm0, %v215_v3 }
   0x2   :  { %16 = vst.msk [vmem:[#allocation2] sm:$0xff] %vm15_vm0, %v215_v3  ;;  %v182_v4 = vpack.c.bf16 %v23_v1, %v22_v0  ;;  %v25_v5 = vld [vmem:[%s297_s1 + $0x18] sm:$0xff]  ;;  %v26_v7 = vld [vmem:[%s297_s1 + $0x20] sm:$0xff]  ;;  %v27_v8 = vld [vmem:[%s297_s1 + $0x28] sm:$0xff] }
   0x3   :  { %v186_v6 = vpack.c.bf16 %v25_v5, %v24_v2  ;;  %v190_v9 = vpack.c.bf16 %v27_v8, %v26_v7  ;;  %v20_v10 = vld [vmem:[%s298_s0] sm:$0xff]  ;;  %v28_v11 = vld [vmem:[%s297_s1 + $0x30] sm:$0xff]  ;;  %v29_v12 = vld [vmem:[%s297_s1 + $0x38] sm:$0xff] }
   0x4   :  { %183 = vmatprep.subr.bf16.mxu0 %v182_v4  ;;  %179 = vmatprep.mubr.f32.mxu0 %v20_v10  ;;  %v194_v13 = vpack.c.bf16 %v29_v12, %v28_v11  ;;  %v30_v14 = vld [vmem:[%s297_s1 + $0x40] sm:$0xff]  ;;  %v31_v15 = vld [vmem:[%s297_s1 + $0x48] sm:$0xff]  ;;  %v32_v17 = vld [vmem:[%s297_s1 + $0x50] sm:$0xff] }
   0x5   :  { %185 = vmatpush3.bf16.msra.mxu0 %v182_v4  ;;  %v198_v16 = vpack.c.bf16 %v31_v15, %v30_v14  ;;  %v33_v18 = vld [vmem:[%s297_s1 + $0x58] sm:$0xff]  ;;  %v34_v20 = vld [vmem:[%s297_s1 + $0x60] sm:$0xff]  ;;  %v35_v21 = vld [vmem:[%s297_s1 + $0x68] sm:$0xff] }
   0x6   :  { %187 = vmatprep.subr.bf16.mxu0 %v186_v6  ;;  %v202_v19 = vpack.c.bf16 %v33_v18, %v32_v17  ;;  %v206_v22 = vpack.c.bf16 %v35_v21, %v34_v20  ;;  %v36_v23 = vld [vmem:[%s297_s1 + $0x70] sm:$0xff]  ;;  %v37_v24 = vld [vmem:[%s297_s1 + $0x78] sm:$0xff]  ;;  %v21_v26 = vld [vmem:[%s298_s0 + $0x8] sm:$0xff] }
   0x7   :  { %v210_v25 = vpack.c.bf16 %v37_v24, %v36_v23 }
   0x8   :  { %v19_v27 = vld [vmem:[#allocation2 + $0x8] sm:$0xff] }
   0x9   :  { %189 = vmatpush3.bf16.msra.mxu0 %v186_v6  ;;  %v18_v28 = vld [vmem:[#allocation2] sm:$0xff] }
   0xa   :  { %191 = vmatprep.subr.bf16.mxu0 %v190_v9 }
   0xd   :  { %193 = vmatpush3.bf16.msra.mxu0 %v190_v9 }
   0xe   :  { %195 = vmatprep.subr.bf16.mxu0 %v194_v13 }
  0x11   :  { %197 = vmatpush3.bf16.msra.mxu0 %v194_v13 }
  0x12   :  { %199 = vmatprep.subr.bf16.mxu0 %v198_v16 }
  0x15   :  { %201 = vmatpush3.bf16.msra.mxu0 %v198_v16 }
  0x16   :  { %203 = vmatprep.subr.bf16.mxu0 %v202_v19 }
  0x19   :  { %205 = vmatpush3.bf16.msra.mxu0 %v202_v19 }
  0x1a   :  { %207 = vmatprep.subr.bf16.mxu0 %v206_v22 }
  0x1d   :  { %209 = vmatpush3.bf16.msra.mxu0 %v206_v22 }
  0x1e   :  { %211 = vmatprep.subr.bf16.mxu0 %v210_v25 }
  0x21   :  { %213 = vmatpush3.bf16.msra.mxu0 %v210_v25 }
  0x24   :  { %180 = vmatmul.mubr.f32.vlgmr.msra.gmra.mrb[0].mxu0 %v21_v26 }
  0xf7   :  { %v181_v29 = vpop.f32.mrb[0].mxu0 }
  0xf8   :  { %v114_v30 = vadd.f32 %v181_v29, %v19_v27  ;;  %v104_v31 = vpop.f32.mrb[1].mxu0 }
  0xf9   :  { %v113_v32 = vadd.f32 %v104_v31, %v18_v28 }
  0xfa   :  { %117 = vst.msk [vmem:[#allocation2 + $0x8] sm:$0xff] %vm15_vm0, %v114_v30 }
  0xfb   :  { %116 = vst.msk [vmem:[#allocation2] sm:$0xff] %vm15_vm0, %v113_v32 }
 0x101   :  { %v122_v33 = vld [vmem:[#allocation2 + $0x8] sm:$0xff] }
 0x102   :  { %124 = vst.msk [vmem:[%s299_s2 + $0x8] sm:$0xff] %vm15_vm0, %v122_v33  ;;  %v121_v34 = vld [vmem:[#allocation2] sm:$0xff] }
 0x103   :  { %123 = vst.msk [vmem:[%s299_s2] sm:$0xff] %vm15_vm0, %v121_v34 }

</bundles_post_ra>
